<compile_context>
chip_gen: v5e
topology: v5e:2x2
jax: 0.10.0
libtpu: 0.0.40
codegen_flags: <defaults>
</compile_context>

<pallas_src>
import jax
import jax.numpy as jnp
from jax.experimental import pallas as pl
from jax.experimental.pallas import tpu as pltpu

IN_FEATURES = 28 * 28   # 784 = 98 * 8 -> sublane-aligned, no K padding needed
HIDDEN = 128
OUT_FEATURES = 10

N_PAD = 128             # lane-dense output slab; real 10 columns sliced in wrapper
MAX_TB = 2048           # bf16 x tile = 2048*784*2B ~ 3.1 MiB (double-buffered ~6.3 MiB)


def folded_linear_kernel(x_ref, w_ref, b_ref, o_ref):
    # (tb, 784)bf16 @ (784, 128)bf16 on the MXU with f32 accumulation, + f32 bias.
    o_ref[...] = (
        jnp.dot(x_ref[...], w_ref[...], preferred_element_type=jnp.float32)
        + b_ref[...]
    ).astype(o_ref.dtype)


def fold_params(w1, b1, w2, b2):
    """Fold fc1 -> fc2 (no activation between them) into a single linear.

    Exact in f32; do this ONCE per model, not per forward call.
    Returns (w_p, b_p): bf16 (784, 128) weight slab and f32 (1, 128) bias slab,
    both zero-padded on the output dim from 10 -> 128 for lane-dense stores.
    """
    w = w1 @ w2                 # (784, 10)
    b = b1 @ w2 + b2            # (1, 10)
    w_p = (
        jnp.zeros((IN_FEATURES, N_PAD), jnp.float32)
        .at[:, :OUT_FEATURES].set(w)
    ).astype(jnp.bfloat16)
    b_p = jnp.zeros((1, N_PAD), jnp.float32).at[:, :OUT_FEATURES].set(b)
    return w_p, b_p


def _round_up(n, m):
    return -(-n // m) * m


def cnn_example_forward(x, w_p, b_p):
    """Forward of CNN_Example with pre-folded params.

    x:   (B, 784) float32 or bfloat16
    w_p: (784, 128) bfloat16 folded weight (from fold_params)
    b_p: (1, 128) float32 folded bias      (from fold_params)
    Returns (B, 10) float32.
    """
    B = x.shape[0]

    # Stream x in bf16 (no-op if the caller already provides bf16).
    x = x.astype(jnp.bfloat16)

    # Pad batch at most to the next multiple of 8 (sublane); never to a tile multiple.
    B8 = _round_up(B, 8)
    if B8 != B:
        x = jnp.pad(x, ((0, B8 - B), (0, 0)))

    # Batch tile: aim for >= 2 grid steps (v7x has two TensorCores), cap at MAX_TB.
    if B8 <= 8:
        tb = B8
    else:
        tb = min(_round_up(-(-B8 // 2), 8), MAX_TB)
    grid = (pl.cdiv(B8, tb),)   # last block may be partial; padded rows are sliced off

    out_padded = pl.pallas_call(
        folded_linear_kernel,
        out_shape=jax.ShapeDtypeStruct((B8, N_PAD), jnp.float32),
        grid_spec=pltpu.PrefetchScalarGridSpec(
            num_scalar_prefetch=0,
            grid=grid,
            in_specs=[
                # x: tiled over batch; last dim = full 784 (equals array dim -> legal).
                pl.BlockSpec((tb, IN_FEATURES), lambda i: (i, 0)),
                # Folded weight / bias: constant index_map -> resident in VMEM.
                pl.BlockSpec((IN_FEATURES, N_PAD), lambda i: (0, 0)),
                pl.BlockSpec((1, N_PAD), lambda i: (0, 0)),
            ],
            out_specs=pl.BlockSpec((tb, N_PAD), lambda i: (i, 0)),
        ),
        compiler_params=pltpu.CompilerParams(
            # Batch tiles are independent -> shard across TensorCores on v7x.
            dimension_semantics=("parallel",),
        ),
    )(x, w_p, b_p)

    # Strip batch padding and the zero-padded output lanes.
    return out_padded[:B, :OUT_FEATURES]


def init_params(key):
    """Deterministic init mirroring torch.nn.Linear default (uniform +/- 1/sqrt(fan_in))."""
    k1, k2, k3, k4 = jax.random.split(key, 4)
    bound1 = 1.0 / (IN_FEATURES ** 0.5)
    bound2 = 1.0 / (HIDDEN ** 0.5)
    # Stored as (in, out) — the transpose of PyTorch's (out, in) — so math is x @ W.
    w1 = jax.random.uniform(k1, (IN_FEATURES, HIDDEN), jnp.float32,
                            minval=-bound1, maxval=bound1)
    b1 = jax.random.uniform(k2, (1, HIDDEN), jnp.float32,
                            minval=-bound1, maxval=bound1)
    w2 = jax.random.uniform(k3, (HIDDEN, OUT_FEATURES), jnp.float32,
                            minval=-bound2, maxval=bound2)
    b2 = jax.random.uniform(k4, (1, OUT_FEATURES), jnp.float32,
                            minval=-bound2, maxval=bound2)
    return w1, b1, w2, b2


if __name__ == "__main__":
    key = jax.random.PRNGKey(0)
    k_x, k_p = jax.random.split(key)

    B = 8  # small batch
    x = jax.random.normal(k_x, (B, IN_FEATURES), jnp.float32)
    w1, b1, w2, b2 = init_params(k_p)

    # Hoisted, once-per-model fold + pad + bf16 cast.
    w_p, b_p = fold_params(w1, b1, w2, b2)
    w_p, b_p = jax.block_until_ready((w_p, b_p))

    forward = jax.jit(cnn_example_forward)
    out = forward(x, w_p, b_p)
    out = jax.block_until_ready(out)

    # Pure-JAX f32 reference (unfused two-layer forward). bf16 streaming -> loose tol.
    ref = (x @ w1 + b1) @ w2 + b2
    assert out.shape == (B, OUT_FEATURES)
    assert jnp.allclose(out, ref, atol=2e-2, rtol=2e-2), (
        float(jnp.max(jnp.abs(out - ref))))

    print("KERNEL_OK")
</pallas_src>

<mosaic_0001>
module attributes {stable_mosaic.version = 11 : i64} {
  func.func @folded_linear_kernel(%arg0: i32, %arg1: memref<8x784xbf16, #tpu.memory_space<vmem>>, %arg2: memref<784x128xbf16, #tpu.memory_space<vmem>>, %arg3: memref<1x128xf32, #tpu.memory_space<vmem>>, %arg4: memref<8x128xf32, #tpu.memory_space<vmem>>) attributes {dimension_semantics = [#tpu.dimension_semantics<parallel>], iteration_bounds = array<i64: 1>, scalar_prefetch = 0 : i64, scratch_operands = 0 : i64, tpu.core_type = #tpu.core_type<tc>, window_params = [{transform_indices = @transform_0, window_bounds = array<i64: 8, 784>}, {pipeline_mode = #tpu.pipeline_mode<synchronous>, transform_indices = @transform_1, window_bounds = array<i64: 784, 128>}, {pipeline_mode = #tpu.pipeline_mode<synchronous>, transform_indices = @transform_2, window_bounds = array<i64: 1, 128>}, {transform_indices = @transform_3, window_bounds = array<i64: 8, 128>}]} {
    %c0 = arith.constant 0 : index
    %c0_0 = arith.constant 0 : index
    %0 = vector.load %arg1[%c0, %c0_0] : memref<8x784xbf16, #tpu.memory_space<vmem>>, vector<8x784xbf16>
    %c0_1 = arith.constant 0 : index
    %c0_2 = arith.constant 0 : index
    %1 = vector.load %arg2[%c0_1, %c0_2] : memref<784x128xbf16, #tpu.memory_space<vmem>>, vector<784x128xbf16>
    %cst = arith.constant dense<0.000000e+00> : vector<8x128xf32>
    %2 = tpu.matmul %0, %1, %cst {dimension_numbers = #tpu.dot_dimension_numbers<[1], [0], [0], [1], [0, 0, 1, 1], [], []>} : vector<8x784xbf16>, vector<784x128xbf16>, vector<8x128xf32> -> vector<8x128xf32>
    %c0_3 = arith.constant 0 : index
    %c0_4 = arith.constant 0 : index
    %3 = vector.load %arg3[%c0_3, %c0_4] : memref<1x128xf32, #tpu.memory_space<vmem>>, vector<1x128xf32>
    %4 = vector.broadcast %3 : vector<1x128xf32> to vector<8x128xf32>
    %5 = arith.addf %2, %4 : vector<8x128xf32>
    %c0_5 = arith.constant 0 : index
    %c0_6 = arith.constant 0 : index
    %6 = vector.load %arg4[%c0_5, %c0_6] : memref<8x128xf32, #tpu.memory_space<vmem>>, vector<8x128xf32>
    tpu.vector_store %arg4[%c0_5, %c0_6], %5 {strides = array<i32>} : memref<8x128xf32, #tpu.memory_space<vmem>>, vector<8x128xf32>,
    return
  }
  func.func @transform_0(%arg0: i32) -> (i32, i32) {
    %c0_i32 = arith.constant 0 : i32
    %c0_i32_0 = arith.constant 0 : i32
    return %arg0, %c0_i32 : i32, i32
  }
  func.func @transform_1(%arg0: i32) -> (i32, i32) {
    %c0_i32 = arith.constant 0 : i32
    %c0_i32_0 = arith.constant 0 : i32
    %c0_i32_1 = arith.constant 0 : i32
    return %c0_i32, %c0_i32_0 : i32, i32
  }
  func.func @transform_2(%arg0: i32) -> (i32, i32) {
    %c0_i32 = arith.constant 0 : i32
    %c0_i32_0 = arith.constant 0 : i32
    %c0_i32_1 = arith.constant 0 : i32
    return %c0_i32, %c0_i32_0 : i32, i32
  }
  func.func @transform_3(%arg0: i32) -> (i32, i32) {
    %c0_i32 = arith.constant 0 : i32
    %c0_i32_0 = arith.constant 0 : i32
    return %arg0, %c0_i32 : i32, i32
  }
}

</mosaic_0001>

<bundles_post_ra>
// kernel: cnn_example_forward.1
= control target key start
LH: loop header
LB: loop body
LE: loop exit
PB: predicated region body
PF: predicated region fallthrough
CT: control target
= control target key end

     0   :  { %8 = vsyncpa [#allocation3], 0  ;;  %s917_s0 = inlined_call_operand.vmem [shape: bf16[8,784], index: 0, kind: input, shape index: {}]   ;;  %s918_s1 = inlined_call_operand.hbm [shape: bf16[784,128], index: 1, kind: input, shape index: {}]   ;;  %s919_s2 = inlined_call_operand.vmem [shape: f32[1,128], index: 2, kind: input, shape index: {}]   ;;  %s920_s3 = inlined_call_operand.hbm [shape: f32[8,128], index: 3, kind: output, shape index: {}]  }
   0x1   :  { %9 = vsyncpa [#allocation4], 0  ;;  %s16_s14 = sshll.u32 %s918_s1, 4  ;;  %s872_s15 = smov [#allocation2]   ;;  %s17_s14 = int_to_ptr.hbm [resolvable:$true] %s16_s14 }
   0x2   :  { %s18_s16 = sshll.u32 %s872_s15, 4  ;;  %s873_s17 = smov 64   ;;  %s19_s16 = int_to_ptr.vmem [resolvable:$true] %s18_s16 }
   0x3   :  { %s874_s18 = smov 4  }
   0x4   :  { %24 = dma.hbm_to_vmem [thread:$0]  %s17_s14, 6272, %s19_s16, [#allocation3], %s873_s17, %s873_s17, %s874_s18  }
   0x5   :  { %868 = dma.done.wait [#allocation3], 6272  }
   0x6   :  { %869 = vsyncadd [#allocation3], 4294961024  ;;  %v773_v0 = vld [vmem:[#allocation2 + $0x38] sm:$0xff]  ;;  %v772_v3 = vld [vmem:[#allocation2 + $0x30] sm:$0xff]  ;;  %vm456_vm0 = vcmask 130048   ;;  %s875_s27 = smov [#allocation5]  }
   0x7   :  { %v781_v1 = vld [vmem:[#allocation2 + $0x78] sm:$0xff]  ;;  %460 = vmatpush.bf16.msra.mxu0 %v773_v0  ;;  %v780_v4 = vld [vmem:[#allocation2 + $0x70] sm:$0xff]  ;;  %v771_v8 = vld [vmem:[#allocation2 + $0x28] sm:$0xff]  ;;  %s557_s28 = sshll.u32 %s875_s27, 4  ;;  %s559_s4 = sshll.u32 %s920_s3, 4  ;;  %s558_s28 = int_to_ptr.vmem [resolvable:$true] %s557_s28  ;;  %s560_s4 = int_to_ptr.hbm [resolvable:$true] %s559_s4 }
   0x8   :  { %v789_v2 = vld [vmem:[#allocation2 + $0xb8] sm:$0xff]  ;;  %473 = vmatpush.bf16.msra.mxu1 %v781_v1  ;;  %v788_v5 = vld [vmem:[#allocation2 + $0xb0] sm:$0xff]  ;;  %v779_v9 = vld [vmem:[#allocation2 + $0x68] sm:$0xff] }
   0x9   :  { %486 = vmatpush.bf16.msra.mxu2 %v789_v2  ;;  %v797_v6 = vld [vmem:[#allocation2 + $0xf8] sm:$0xff]  ;;  %v796_v7 = vld [vmem:[#allocation2 + $0xf0] sm:$0xff]  ;;  %v787_v10 = vld [vmem:[#allocation2 + $0xa8] sm:$0xff] }
   0xa   :  { %499 = vmatpush.bf16.msra.mxu3 %v797_v6  ;;  %v795_v11 = vld [vmem:[#allocation2 + $0xe8] sm:$0xff]  ;;  %v770_v12 = vld [vmem:[#allocation2 + $0x20] sm:$0xff]  ;;  %v769_v16 = vld [vmem:[#allocation2 + $0x18] sm:$0xff] }
   0xb   :  { %461 = vmatpush.bf16.msra.mxu0 %v772_v3  ;;  %v778_v13 = vld [vmem:[#allocation2 + $0x60] sm:$0xff]  ;;  %v777_v17 = vld [vmem:[#allocation2 + $0x58] sm:$0xff]  ;;  %v768_v20 = vld [vmem:[#allocation2 + $0x10] sm:$0xff] }
   0xc   :  { %474 = vmatpush.bf16.msra.mxu1 %v780_v4  ;;  %v786_v14 = vld [vmem:[#allocation2 + $0xa0] sm:$0xff]  ;;  %v785_v18 = vld [vmem:[#allocation2 + $0x98] sm:$0xff]  ;;  %v776_v21 = vld [vmem:[#allocation2 + $0x50] sm:$0xff] }
   0xd   :  { %487 = vmatpush.bf16.msra.mxu2 %v788_v5  ;;  %v794_v15 = vld [vmem:[#allocation2 + $0xe0] sm:$0xff]  ;;  %v793_v19 = vld [vmem:[#allocation2 + $0xd8] sm:$0xff]  ;;  %v784_v22 = vld [vmem:[#allocation2 + $0x90] sm:$0xff] }
   0xe   :  { %500 = vmatpush.bf16.msra.mxu3 %v796_v7  ;;  %v792_v23 = vld [vmem:[#allocation2 + $0xd0] sm:$0xff]  ;;  %v767_v24 = vld [vmem:[#allocation2 + $0x8] sm:$0xff]  ;;  %v32_v26 = vld [vmem:[%s917_s0] sm:$0xff] }
   0xf   :  { %462 = vmatpush.bf16.msra.mxu0 %v771_v8  ;;  %v775_v25 = vld [vmem:[#allocation2 + $0x48] sm:$0xff]  ;;  %v142_v30 = vunpack.c.l.b16 %v32_v26  ;;  %v143_v31 = vunpack.c.h.b16 %v32_v26  ;;  %v766_v32 = vld [vmem:[#allocation2] sm:$0xff]  ;;  %v805_v36 = vld [vmem:[#allocation2 + $0x138] sm:$0xff] }
  0x10   :  { %475 = vmatpush.bf16.msra.mxu1 %v779_v9  ;;  %v783_v27 = vld [vmem:[#allocation2 + $0x88] sm:$0xff]  ;;  %v774_v33 = vld [vmem:[#allocation2 + $0x40] sm:$0xff]  ;;  %v813_v37 = vld [vmem:[#allocation2 + $0x178] sm:$0xff] }
  0x11   :  { %488 = vmatpush.bf16.msra.mxu2 %v787_v10  ;;  %v33_v28 = vld [vmem:[%s917_s0 + $0x8] sm:$0xff]  ;;  %v782_v35 = vld [vmem:[#allocation2 + $0x80] sm:$0xff]  ;;  %v149_v39 = vpack.c.b16 %v142_v30, %v142_v30  ;;  %v150_v40 = vpack.c.b16 %v143_v31, %v143_v31  ;;  %v804_v44 = vld [vmem:[#allocation2 + $0x130] sm:$0xff] }
  0x12   :  { %501 = vmatpush.bf16.msra.mxu3 %v795_v11  ;;  %v791_v29 = vld [vmem:[#allocation2 + $0xc8] sm:$0xff]  ;;  %v144_v34 = vunpack.c.l.b16 %v33_v28  ;;  %v814_v38 = vld [vmem:[#allocation2 + $0x180] sm:$0xff]  ;;  %v145_v41 = vunpack.c.h.b16 %v33_v28  ;;  %v812_v45 = vld [vmem:[#allocation2 + $0x170] sm:$0xff] }
  0x13   :  { %463 = vmatpush.bf16.msra.mxu0 %v770_v12  ;;  %v790_v43 = vld [vmem:[#allocation2 + $0xc0] sm:$0xff]  ;;  %v803_v47 = vld [vmem:[#allocation2 + $0x128] sm:$0xff]  ;;  %v35_v50 = vld [vmem:[%s917_s0 + $0x18] sm:$0xf] }
  0x14   :  { %476 = vmatpush.bf16.msra.mxu1 %v778_v13  ;;  %v151_v42 = vpack.c.b16 %v144_v34, %v144_v34  ;;  %v152_v46 = vpack.c.b16 %v145_v41, %v145_v41  ;;  %v811_v48 = vld [vmem:[#allocation2 + $0x168] sm:$0xff]  ;;  %v802_v49 = vld [vmem:[#allocation2 + $0x120] sm:$0xff]  ;;  %v148_v52 = vunpack.c.l.b16 %v35_v50  ;;  %v801_v53 = vld [vmem:[#allocation2 + $0x118] sm:$0xff] }
  0x15   :  { %489 = vmatpush.bf16.msra.mxu2 %v786_v14  ;;  %v810_v51 = vld [vmem:[#allocation2 + $0x160] sm:$0xff]  ;;  %v809_v54 = vld [vmem:[#allocation2 + $0x158] sm:$0xff]  ;;  %v800_v56 = vld [vmem:[#allocation2 + $0x110] sm:$0xff] }
  0x16   :  { %502 = vmatpush.bf16.msra.mxu3 %v794_v15  ;;  %v155_v55 = vpack.c.b16 %v148_v52, %v148_v52  ;;  %v808_v57 = vld [vmem:[#allocation2 + $0x150] sm:$0xff]  ;;  %v799_v58 = vld [vmem:[#allocation2 + $0x108] sm:$0xff]  ;;  %v798_v62 = vld [vmem:[#allocation2 + $0x100] sm:$0xff] }
  0x17   :  { %464 = vmatpush.bf16.msra.mxu0 %v769_v16  ;;  %v34_v59 = vld [vmem:[%s917_s0 + $0x10] sm:$0xff]  ;;  %v807_v60 = vld [vmem:[#allocation2 + $0x148] sm:$0xff]  ;;  %v806_v0 = vld [vmem:[#allocation2 + $0x140] sm:$0xff] }
  0x18   :  { %477 = vmatpush.bf16.msra.mxu1 %v777_v17  ;;  %v146_v61 = vunpack.c.l.b16 %v34_v59  ;;  %v147_v63 = vunpack.c.h.b16 %v34_v59  ;;  %v819_v9 = vld [vmem:[%s919_s2] ss:$0 sm:$0xff] }
  0x19   :  { %490 = vmatpush.bf16.msra.mxu2 %v785_v18 }
  0x1a   :  { %503 = vmatpush.bf16.msra.mxu3 %v793_v19  ;;  %v153_v1 = vpack.c.b16 %v146_v61, %v146_v61  ;;  %v154_v2 = vpack.c.b16 %v147_v63, %v147_v63 }
  0x1b   :  { %465 = vmatpush.bf16.msra.mxu0 %v768_v20 }
  0x1c   :  { %478 = vmatpush.bf16.msra.mxu1 %v776_v21 }
  0x1d   :  { %491 = vmatpush.bf16.msra.mxu2 %v784_v22 }
  0x1e   :  { %504 = vmatpush.bf16.msra.mxu3 %v792_v23 }
  0x1f   :  { %466 = vmatpush.bf16.msra.mxu0 %v767_v24 }
  0x20   :  { %479 = vmatpush.bf16.msra.mxu1 %v775_v25 }
  0x21   :  { %492 = vmatpush.bf16.msra.mxu2 %v783_v27 }
  0x22   :  { %505 = vmatpush.bf16.msra.mxu3 %v791_v29 }
  0x23   :  { %467 = vmatpush.bf16.msra.mxu0 %v766_v32 }
  0x24   :  { %480 = vmatpush.bf16.msra.mxu1 %v774_v33 }
  0x25   :  { %493 = vmatpush.bf16.msra.mxu2 %v782_v35 }
  0x26   :  { %468 = vmatmul.bf16.vlgmr.msra.gmra.mxu0 %v149_v39  ;;  %506 = vmatpush.bf16.msra.mxu3 %v790_v43 }
  0x27   :  { %512 = vmatpush.bf16.msrb.mxu0 %v805_v36  ;;  %481 = vmatmul.bf16.vlgmr.msra.gmra.mxu1 %v150_v40 }
  0x28   :  { %525 = vmatpush.bf16.msrb.mxu1 %v813_v37  ;;  %494 = vmatmul.bf16.vlgmr.msra.gmra.mxu2 %v151_v42 }
  0x29   :  { %545 = vmatpush.bf16.msrb.mxu2 %v814_v38  ;;  %507 = vmatmul.bf16.vlgmr.msra.gmra.mxu3 %v152_v46 }
  0x2b   :  { %513 = vmatpush.bf16.msrb.mxu0 %v804_v44 }
  0x2c   :  { %526 = vmatpush.bf16.msrb.mxu1 %v812_v45 }
  0x2f   :  { %514 = vmatpush.bf16.msrb.mxu0 %v803_v47 }
  0x30   :  { %527 = vmatpush.bf16.msrb.mxu1 %v811_v48 }
  0x33   :  { %515 = vmatpush.bf16.msrb.mxu0 %v802_v49 }
  0x34   :  { %528 = vmatpush.bf16.msrb.mxu1 %v810_v51 }
  0x37   :  { %516 = vmatpush.bf16.msrb.mxu0 %v801_v53 }
  0x38   :  { %529 = vmatpush.bf16.msrb.mxu1 %v809_v54  ;;  %765 = vmatmul.msk.bf16.vlgmr.msrb.gmra.mxu2 %vm456_vm0, %v155_v55 }
  0x3b   :  { %517 = vmatpush.bf16.msrb.mxu0 %v800_v56 }
  0x3c   :  { %530 = vmatpush.bf16.msrb.mxu1 %v808_v57 }
  0x3f   :  { %518 = vmatpush.bf16.msrb.mxu0 %v799_v58 }
  0x40   :  { %531 = vmatpush.bf16.msrb.mxu1 %v807_v60 }
  0x43   :  { %519 = vmatpush.bf16.msrb.mxu0 %v798_v62 }
  0x44   :  { %532 = vmatpush.bf16.msrb.mxu1 %v806_v0 }
  0x46   :  { %520 = vmatmul.bf16.vlgmr.msrb.gmra.mxu0 %v153_v1 }
  0x47   :  { %533 = vmatmul.bf16.vlgmr.msrb.gmra.mxu1 %v154_v2 }
  0xa3   :  { %v469_v3 = vpop.f32.mrf.mxu0 }
  0xa4   :  { %v482_v4 = vpop.f32.mrf.mxu1  ;;  %v470_v11 = vadd.f32 %v819_v9, %v469_v3 }
  0xa6   :  { %v483_v13 = vadd.f32 %v482_v4, %v470_v11 }
  0xab   :  { %v495_v5 = vpop.f32.mrf.mxu2  ;;  %v471_v6 = vpop.f32.mrf.mxu0 }
  0xac   :  { %v484_v7 = vpop.f32.mrf.mxu1  ;;  %v508_v8 = vpop.f32.mrf.mxu3  ;;  %v496_v15 = vadd.f32 %v495_v5, %v483_v13 }
  0xae   :  { %v509_v16 = vadd.f32 %v508_v8, %v496_v15 }
  0xb3   :  { %v497_v10 = vpop.f32.mrf.mxu2 }
  0xb4   :  { %v510_v12 = vpop.f32.mrf.mxu3 }
  0xbb   :  { %v547_v14 = vpop.f32.mrf.mxu2 }
  0xc3   :  { %v521_v17 = vpop.f32.mrf.mxu0  ;;  %v549_v20 = vpop.f32.mrf.mxu2 }
  0xc4   :  { %v522_v18 = vadd.f32 %v521_v17, %v509_v16  ;;  %v534_v19 = vpop.f32.mrf.mxu1 }
  0xc6   :  { %v535_v21 = vadd.f32 %v534_v19, %v522_v18 }
  0xc8   :  { %v548_v22 = vadd.f32 %v547_v14, %v535_v21 }
  0xca   :  { %551 = vst [vmem:[#allocation5] sm:$0xff] %v548_v22 }
  0xcb   :  { %v523_v23 = vpop.f32.mrf.mxu0  ;;  %562 = dma.vmem_to_hbm [thread:$0]  %s558_s28, 128, %s560_s4, [#allocation4]  }
  0xcc   :  { %v536_v24 = vpop.f32.mrf.mxu1 }
  0xcd   :  { %870 = dma.done.wait [#allocation4], 128  }
  0xce   :  { %871 = vsyncadd [#allocation4], 4294967168 }
  0xcf   :  { %567 = vsyncpa [#allocation3], 1 }
  0xd0   :  { %568 = vsyncpa [#allocation4], 1 }

</bundles_post_ra>
